<compile_context>
chip_gen: v7x
topology: tpu7x:2x2x1
jax: 0.10.0
libtpu: 0.0.40
codegen_flags: <defaults>
</compile_context>

<pallas_src>
import functools

import jax
import jax.numpy as jnp
from jax.experimental import pallas as pl
from jax.experimental.pallas import tpu as pltpu


_NEG = -1e30  # "minus infinity" score for masked entries -> hinge clamps to exactly 0.


def _ceil_to(x, m):
    return ((x + m - 1) // m) * m


def _pad_rows(x, mult):
    n = x.shape[0]
    np_ = _ceil_to(n, mult)
    if np_ == n:
        return x
    return jnp.pad(x, ((0, np_ - n), (0, 0)))


# ----------------------------------------------------------------------------
# Kernel 1: cosine_sim(im, s) = im @ s.T  (tiled, lane-dense f32 output tiles)
# ----------------------------------------------------------------------------
def _matmul_kernel(im_ref, s_ref, out_ref):
    # Contract the feature dim of both operands directly on the MXU; no
    # transposed copy of the s tile is materialized.
    out_ref[...] = jax.lax.dot_general(
        im_ref[...], s_ref[...],
        dimension_numbers=(((1,), (1,)), ((), ())),
        preferred_element_type=jnp.float32)


def cosine_sim(im, s, *, block=128, compute_dtype=jnp.bfloat16):
    """im @ s.T as a tiled Pallas matmul (bf16 MXU inputs, f32 output)."""
    n, d = im.shape
    m, d2 = s.shape
    assert d == d2
    im_p = _pad_rows(im, block).astype(compute_dtype)
    s_p = _pad_rows(s, block).astype(compute_dtype)
    np_, mp_ = im_p.shape[0], s_p.shape[0]
    out = pl.pallas_call(
        _matmul_kernel,
        out_shape=jax.ShapeDtypeStruct((np_, mp_), jnp.float32),
        grid=(np_ // block, mp_ // block),
        in_specs=[
            pl.BlockSpec((block, d), lambda i, j: (i, 0)),
            pl.BlockSpec((block, d), lambda i, j: (j, 0)),
        ],
        out_specs=pl.BlockSpec((block, block), lambda i, j: (i, j)),
        compiler_params=pltpu.CompilerParams(
            dimension_semantics=("parallel", "parallel")),
    )(im_p, s_p)
    return out[:n, :m]


# ----------------------------------------------------------------------------
# Kernel 2: pairwise diagonal  diag[i] = <im_i, s_i>   (O(N*D), f32 accumulate)
# ----------------------------------------------------------------------------
def _diag_kernel(im_ref, s_ref, out_ref):
    prod = im_ref[...].astype(jnp.float32) * s_ref[...].astype(jnp.float32)
    out_ref[...] = jnp.sum(prod, axis=1, keepdims=True)


def _pairwise_diag(im_p, s_p, *, block):
    np_, d = im_p.shape
    return pl.pallas_call(
        _diag_kernel,
        out_shape=jax.ShapeDtypeStruct((np_, 1), jnp.float32),
        grid=(np_ // block,),
        in_specs=[
            pl.BlockSpec((block, d), lambda i: (i, 0)),
            pl.BlockSpec((block, d), lambda i: (i, 0)),
        ],
        out_specs=pl.BlockSpec((block, 1), lambda i: (i, 0)),
        compiler_params=pltpu.CompilerParams(dimension_semantics=("parallel",)),
    )(im_p, s_p)


# ----------------------------------------------------------------------------
# Shared per-tile loss update (streamed hinge sums / row-max / col-max)
# ----------------------------------------------------------------------------
def _loss_tile_update(st, d_row, d_col, params_ref, out_ref,
                      sum_acc, rowmax_sum, rowmax_acc, colmax_acc,
                      *, block, n_valid, n_padded, need_sum):
    i = pl.program_id(0)
    j = pl.program_id(1)
    nbi = pl.num_programs(0)
    nbj = pl.num_programs(1)

    margin = params_ref[0]
    k = params_ref[1]
    weight = params_ref[2]

    # -- init resident accumulators on the very first tile --------------------
    @pl.when((i == 0) & (j == 0))
    def _():
        sum_acc[...] = jnp.zeros_like(sum_acc)
        rowmax_sum[...] = jnp.zeros_like(rowmax_sum)
        colmax_acc[...] = jnp.zeros_like(colmax_acc)

    @pl.when(j == 0)  # new row block: reset its running row-max
    def _():
        rowmax_acc[...] = jnp.zeros_like(rowmax_acc)

    # -- mask: diagonal (torch masked_fill_) + zero padding --------------------
    # Excluded entries get score = -1e30, so both hinges clamp them to exactly
    # 0 and they can never win a row/col max.
    rows = i * block + jax.lax.broadcasted_iota(jnp.int32, (block, block), 0)
    cols = j * block + jax.lax.broadcasted_iota(jnp.int32, (block, block), 1)
    exclude = rows == cols
    if n_valid != n_padded:  # static: only traced when padding exists
        exclude = exclude | (rows >= n_valid) | (cols >= n_valid)
    st = jnp.where(exclude, _NEG, st)

    # -- hinge costs ------------------------------------------------------------
    cost_s = jnp.maximum(margin + st - d_row, 0.0)    # (block, block), d1 broadcast
    cost_im = jnp.maximum(margin + st - d_col, 0.0)   # (block, block), d2 broadcast

    # -- streamed reductions -----------------------------------------------------
    if need_sum:  # static: compiled out when k == 1 (max_violation)
        sum_acc[...] += jnp.sum(cost_s) + jnp.sum(cost_im)

    rowmax_acc[...] = jnp.maximum(rowmax_acc[...],
                                  jnp.max(cost_s, axis=1, keepdims=True))

    @pl.when(j == nbj - 1)  # row block finished: fold its row-maxes into the sum
    def _():
        rowmax_sum[...] += jnp.sum(rowmax_acc[...])

    tile_colmax = jnp.max(cost_im, axis=0, keepdims=True)[None]   # (1, 1, block)
    colmax_acc[pl.ds(j, 1), :, :] = jnp.maximum(
        colmax_acc[pl.ds(j, 1), :, :], tile_colmax)

    # -- epilogue: combine everything on the very last tile ----------------------
    @pl.when((i == nbi - 1) & (j == nbj - 1))
    def _():
        total = (rowmax_sum[...] + jnp.sum(colmax_acc[...])) * k
        if need_sum:
            total = total + sum_acc[...] * (1.0 - k)
        out_ref[...] = total * weight


def _fused_loss_kernel(params_ref, im_ref, s_ref, drow_ref, dcol_ref, out_ref,
                       sum_acc, rowmax_sum, rowmax_acc, colmax_acc,
                       *, block, n_valid, n_padded, need_sum):
    st = jax.lax.dot_general(                       # MXU: (block, block) f32
        im_ref[...], s_ref[...],
        dimension_numbers=(((1,), (1,)), ((), ())),
        preferred_element_type=jnp.float32)
    _loss_tile_update(st, drow_ref[...], dcol_ref[...], params_ref, out_ref,
                      sum_acc, rowmax_sum, rowmax_acc, colmax_acc,
                      block=block, n_valid=n_valid, n_padded=n_padded,
                      need_sum=need_sum)


def _scores_loss_kernel(params_ref, scores_ref, drow_ref, dcol_ref, out_ref,
                        sum_acc, rowmax_sum, rowmax_acc, colmax_acc,
                        *, block, n_valid, n_padded, need_sum):
    st = scores_ref[...].astype(jnp.float32)
    _loss_tile_update(st, drow_ref[...], dcol_ref[...], params_ref, out_ref,
                      sum_acc, rowmax_sum, rowmax_acc, colmax_acc,
                      block=block, n_valid=n_valid, n_padded=n_padded,
                      need_sum=need_sum)


def _loss_scratch(block, nb):
    return [
        pltpu.VMEM((1, 1), jnp.float32),          # running sum(cost_s)+sum(cost_im)
        pltpu.VMEM((1, 1), jnp.float32),          # running sum of per-row maxes
        pltpu.VMEM((block, 1), jnp.float32),      # row-max of the current row block
        pltpu.VMEM((nb, 1, block), jnp.float32),  # per-column running max (all col blocks)
    ]


# ----------------------------------------------------------------------------
# Wrappers
# ----------------------------------------------------------------------------
def contrastive_loss_fused(im, s, *, margin, k, weight, block=128,
                           compute_dtype=jnp.bfloat16):
    """Fused sim + loss: the (N, N) scores matrix never touches HBM."""
    n, d = im.shape
    im_p = _pad_rows(im, block).astype(compute_dtype)
    s_p = _pad_rows(s, block).astype(compute_dtype)
    np_ = im_p.shape[0]
    nb = np_ // block

    diag_col = _pairwise_diag(im_p, s_p, block=block)   # (Np, 1) f32
    diag_row = diag_col.reshape(1, np_)                 # (1, Np)

    params = jnp.array([margin, k, weight], dtype=jnp.float32)
    kernel = functools.partial(_fused_loss_kernel, block=block, n_valid=n,
                               n_padded=np_, need_sum=(float(k) != 1.0))
    out = pl.pallas_call(
        kernel,
        out_shape=jax.ShapeDtypeStruct((1, 1), jnp.float32),
        grid=(nb, nb),
        in_specs=[
            pl.BlockSpec(memory_space=pltpu.SMEM),            # [margin, k, weight]
            pl.BlockSpec((block, d), lambda i, j: (i, 0)),    # im rows of the tile
            pl.BlockSpec((block, d), lambda i, j: (j, 0)),    # s rows (= score cols)
            pl.BlockSpec((block, 1), lambda i, j: (i, 0)),    # diag for rows (d1)
            pl.BlockSpec((1, block), lambda i, j: (0, j)),    # diag for cols (d2)
        ],
        out_specs=pl.BlockSpec((1, 1), lambda i, j: (0, 0)),
        scratch_shapes=_loss_scratch(block, nb),
        # Accumulators carry across both grid axes -> keep them "arbitrary".
        compiler_params=pltpu.CompilerParams(
            dimension_semantics=("arbitrary", "arbitrary")),
    )(params, im_p, s_p, diag_col, diag_row)
    return out[0, 0]


def contrastive_loss_from_scores(scores, *, margin, k, weight, block=128):
    """Literal port of ContrastiveLoss.forward(scores), streamed over tiles."""
    n = scores.shape[0]
    np_ = _ceil_to(n, block)
    nb = np_ // block

    scores_f = scores.astype(jnp.float32)
    diag = jnp.diagonal(scores_f)                        # O(N) gather, host-side JAX
    if np_ != n:
        scores_f = jnp.pad(scores_f, ((0, np_ - n), (0, np_ - n)))
        diag = jnp.pad(diag, (0, np_ - n))
    diag_col = diag.reshape(np_, 1)
    diag_row = diag.reshape(1, np_)

    params = jnp.array([margin, k, weight], dtype=jnp.float32)
    kernel = functools.partial(_scores_loss_kernel, block=block, n_valid=n,
                               n_padded=np_, need_sum=(float(k) != 1.0))
    out = pl.pallas_call(
        kernel,
        out_shape=jax.ShapeDtypeStruct((1, 1), jnp.float32),
        grid=(nb, nb),
        in_specs=[
            pl.BlockSpec(memory_space=pltpu.SMEM),
            pl.BlockSpec((block, block), lambda i, j: (i, j)),
            pl.BlockSpec((block, 1), lambda i, j: (i, 0)),
            pl.BlockSpec((1, block), lambda i, j: (0, j)),
        ],
        out_specs=pl.BlockSpec((1, 1), lambda i, j: (0, 0)),
        scratch_shapes=_loss_scratch(block, nb),
        compiler_params=pltpu.CompilerParams(
            dimension_semantics=("arbitrary", "arbitrary")),
    )(params, scores_f, diag_col, diag_row)
    return out[0, 0]


class ContrastiveLoss:
    """JAX/Pallas port of the PyTorch ContrastiveLoss module."""

    def __init__(self, margin=0.2, max_violation=True, weight=1.0, beta=0.999,
                 block=128):
        self.margin = float(margin)
        self.max_violation = max_violation
        self.weight = float(weight)
        self.beta = float(beta)
        self.iteration = 0
        self.k = 0.0
        self.block = block
        self.sim = cosine_sim

    def adjust_k(self):
        # Host-side Python state, exactly like the PyTorch module.
        self.iteration += 1
        if self.max_violation:
            self.k = 1.0
            return 1.0
        self.k = 1.0 - self.beta ** float(self.iteration)
        return self.k

    def __call__(self, scores):
        k = self.adjust_k()
        return contrastive_loss_from_scores(
            scores, margin=self.margin, k=k, weight=self.weight, block=self.block)

    def from_embeddings(self, im, s):
        """Fused sim + loss (recommended): scores never materialized in HBM."""
        k = self.adjust_k()
        return contrastive_loss_fused(
            im, s, margin=self.margin, k=k, weight=self.weight, block=self.block)


# ----------------------------------------------------------------------------
# Pure-JAX reference (mirrors the torch forward)
# ----------------------------------------------------------------------------
def reference_loss(scores, margin, k, weight):
    n = scores.shape[0]
    diag = jnp.diag(scores)
    d1 = diag[:, None]
    d2 = diag[None, :]
    eye = jnp.eye(n, dtype=bool)
    cost_s = jnp.where(eye, 0.0, jnp.maximum(margin + scores - d1, 0.0))
    cost_im = jnp.where(eye, 0.0, jnp.maximum(margin + scores - d2, 0.0))
    cost_all_k = (cost_s.sum() + cost_im.sum()) * (1.0 - k)
    cost_hard_k = (cost_s.max(axis=1).sum() + cost_im.max(axis=0).sum()) * k
    return (cost_all_k + cost_hard_k) * weight


if __name__ == "__main__":
    key = jax.random.PRNGKey(0)
    k_im, k_s = jax.random.split(key)

    # Small, deliberately NOT a multiple of the 128 tile to exercise padding.
    N, D = 200, 96
    BLOCK = 128

    im = jax.random.normal(k_im, (N, D), dtype=jnp.float32)
    s = jax.random.normal(k_s, (N, D), dtype=jnp.float32)
    im = im / jnp.linalg.norm(im, axis=1, keepdims=True)
    s = s / jnp.linalg.norm(s, axis=1, keepdims=True)

    # Pure-JAX reference scores from the same bf16-quantized inputs the kernels use.
    scores_ref = jnp.dot(im.astype(jnp.bfloat16), s.astype(jnp.bfloat16).T,
                         preferred_element_type=jnp.float32)

    # Path A (module spec): explicit scores matrix, then loss(scores).
    loss_mod = ContrastiveLoss(margin=0.2, max_violation=True, weight=1.0, block=BLOCK)
    scores = jax.block_until_ready(cosine_sim(im, s, block=BLOCK))
    loss_a = jax.block_until_ready(loss_mod(scores))                  # k = 1 (max_violation)

    # Path B (fused, recommended): loss straight from embeddings.
    loss_b = jax.block_until_ready(loss_mod.from_embeddings(im, s))

    # Path C: exercises the (1 - k) full-sum branch (max_violation=False).
    loss_mod2 = ContrastiveLoss(margin=0.2, max_violation=False, weight=1.0,
                                beta=0.999, block=BLOCK)
    loss_c = jax.block_until_ready(loss_mod2(scores))                 # k = 1 - 0.999

    # Checks.
    assert scores.shape == (N, N)
    assert jnp.allclose(scores, scores_ref, atol=2e-2, rtol=2e-2), "scores mismatch"

    ref_a = reference_loss(scores, margin=0.2, k=1.0, weight=1.0)
    ref_b = reference_loss(scores_ref, margin=0.2, k=1.0, weight=1.0)
    ref_c = reference_loss(scores, margin=0.2, k=loss_mod2.k, weight=1.0)
    assert jnp.allclose(loss_a, ref_a, rtol=5e-3, atol=1e-2), (loss_a, ref_a)
    assert jnp.allclose(loss_b, ref_b, rtol=5e-3, atol=1e-2), (loss_b, ref_b)
    assert jnp.allclose(loss_c, ref_c, rtol=5e-3, atol=1e-2), (loss_c, ref_c)

    print("KERNEL_OK")
</pallas_src>

<mosaic_0001>
module attributes {stable_mosaic.version = 11 : i64} {
  func.func @_matmul_kernel(%arg0: i32, %arg1: i32, %arg2: memref<128x96xbf16, #tpu.memory_space<vmem>>, %arg3: memref<128x96xbf16, #tpu.memory_space<vmem>>, %arg4: memref<128x128xf32, #tpu.memory_space<vmem>>) attributes {dimension_semantics = [#tpu.dimension_semantics<parallel>, #tpu.dimension_semantics<parallel>], iteration_bounds = array<i64: 2, 2>, scalar_prefetch = 0 : i64, scratch_operands = 0 : i64, tpu.core_type = #tpu.core_type<tc>, window_params = [{transform_indices = @transform_0, window_bounds = array<i64: 128, 96>}, {transform_indices = @transform_1, window_bounds = array<i64: 128, 96>}, {transform_indices = @transform_2, window_bounds = array<i64: 128, 128>}]} {
    %c0 = arith.constant 0 : index
    %c0_0 = arith.constant 0 : index
    %0 = vector.load %arg2[%c0, %c0_0] : memref<128x96xbf16, #tpu.memory_space<vmem>>, vector<128x96xbf16>
    %c0_1 = arith.constant 0 : index
    %c0_2 = arith.constant 0 : index
    %1 = vector.load %arg3[%c0_1, %c0_2] : memref<128x96xbf16, #tpu.memory_space<vmem>>, vector<128x96xbf16>
    %cst = arith.constant dense<0.000000e+00> : vector<128x128xf32>
    %2 = tpu.matmul %0, %1, %cst {dimension_numbers = #tpu.dot_dimension_numbers<[1], [1], [0], [0], [0, 0, 1, 0], [], []>} : vector<128x96xbf16>, vector<128x96xbf16>, vector<128x128xf32> -> vector<128x128xf32>
    %c0_3 = arith.constant 0 : index
    %c0_4 = arith.constant 0 : index
    %3 = vector.load %arg4[%c0_3, %c0_4] : memref<128x128xf32, #tpu.memory_space<vmem>>, vector<128x128xf32>
    tpu.vector_store %arg4[%c0_3, %c0_4], %2 {strides = array<i32>} : memref<128x128xf32, #tpu.memory_space<vmem>>, vector<128x128xf32>,
    return
  }
  func.func @transform_0(%arg0: i32, %arg1: i32) -> (i32, i32) {
    %c0_i32 = arith.constant 0 : i32
    %c0_i32_0 = arith.constant 0 : i32
    return %arg0, %c0_i32 : i32, i32
  }
  func.func @transform_1(%arg0: i32, %arg1: i32) -> (i32, i32) {
    %c0_i32 = arith.constant 0 : i32
    %c0_i32_0 = arith.constant 0 : i32
    return %arg1, %c0_i32 : i32, i32
  }
  func.func @transform_2(%arg0: i32, %arg1: i32) -> (i32, i32) {
    %c0_i32 = arith.constant 0 : i32
    return %arg0, %arg1 : i32, i32
  }
}

</mosaic_0001>

<bundles_post_ra>
// kernel: tpu_custom_call.1
= control target key start
LH: loop header
LB: loop body
LE: loop exit
PB: predicated region body
PF: predicated region fallthrough
CT: control target
= control target key end

     0   :  { %7 = vsyncpa [#allocation3], 0  ;;  %s1101_s0 = inlined_call_operand.vmem [shape: bf16[256,96], index: 0, kind: input, shape index: {}]   ;;  %s1102_s1 = inlined_call_operand.vmem [shape: bf16[256,96], index: 1, kind: input, shape index: {}]   ;;  %s1103_s2 = inlined_call_operand.hbm [shape: f32[256,256], index: 2, kind: output, shape index: {}]  }
   0x1   :  { %9 = vsyncpa [#allocation3 + $0x1], 0  ;;  %s885_s9 = smov 0   ;;  %s887_s10 = smov 0  }
   0x2   :  { %s889_s11 = smov 0   ;;  %s891_s12 = smov 0  }
   0x3   :  { %s893_s13 = smov 0   ;;  %s895_s14 = smov 0  }
   0x4   :  { %s897_s15 = smov 0   ;;  %s899_s16 = smov 0  }
   0x5 LB: > { %s559_s17 = sadd.s32 4294967295, %s864_s16   ;;  %s560_s18 = sadd.s32 4294967294, %s864_s16   ;;  %s864_s16 = sphi %s899_s16, %s15_s16   ;;  %s860_s15 = sphi %s897_s15, %s1112_s15   ;;  %s856_s14 = sphi %s895_s14, %s1111_s14   ;;  %s852_s13 = sphi %s893_s13, %s1110_s13   ;;  %s848_s12 = sphi %s891_s12, %s1109_s12   ;;  %s844_s11 = sphi %s889_s11, %s1108_s11   ;;  %s840_s10 = sphi %s887_s10, %s1107_s10   ;;  %s836_s9 = sphi %s885_s9, %s1106_s9  }
   0x6   : > { %s24_s19 = sadd.s32 1, %s856_s14  ;;  %s27_s20 = sadd.s32 1, %s860_s15 }
   0x7   : > { %p25_p0 = scmp.ge.s32.totalorder %s24_s19, 2  ;;  %p98_p1 = scmp.ne.s32.totalorder %s844_s11, %s840_s10 }
   0x8   : > { %p99_p2 = scmp.eq.s32.totalorder %s559_s17, 3  ;;  %p104_p5 = scmp.ne.s32.totalorder %s840_s10, %s836_s9 }
   0x9   : > { %s1114_s19 = smov (%p25_p0, %s24_s19), 0  ;;  %s1116_s20 = smov (!%p25_p0, %s27_s20), %s860_s15 }
   0xa   : > { %s84_s21 = ssub.s32 %s856_s14, %s1114_s19  ;;  %p936_p3 = por %p99_p2, %p98_p1 }
   0xb   : > { %p29_p4 = scmp.ge.s32.totalorder %s1116_s20, 2  ;;  %p105_p6 = scmp.eq.s32.totalorder %s560_s18, 3 }
   0xc   : > { %p563_p7 = scmp.ge.s32.totalorder %s864_s16, 1  ;;  %p141_p9 = scmp.lt.s32.totalorder %s864_s16, 5 }
   0xd   : > { %s1118_s20 = smov (%p29_p4, %s1116_s20), 0  ;;  %p945_p8 = por %p105_p6, %p104_p5 }
   0xe   : > { %s83_s24 = ssub.s32 %s860_s15, %s1118_s20  ;;  %s88_s25 = sadd.s32 1, %s844_s11 }
   0xf   : > { %s85_s26 = sor.u32 %s84_s21, %s83_s24  ;;  %p142_p10 = pnand %p563_p7, %p141_p9 }
  0x10   : > { %p86_p11 = scmp.eq.s32.totalorder %s85_s26, 0  ;;  %s567_s28 = sshll.u32 (!%p142_p10), %s848_s12, 4  ;;  %vm294_vm0 = vcmask (!%p142_p10), 785408  }
  0x11   : > { %145 = sbr.rel (%p142_p10) target bundleno = 331 (0x14b), region = 28  ;;  %s565_s29 = sshll.u32 (!%p142_p10), %s852_s13, 4 }
  0x12   : > { %s954_s27 = scalar_select %p86_p11, %s844_s11, %s88_s25  }
  0x13   : > { %p175_p12 = scmp.lt.s32.totalorder (!%p142_p10), %s567_s28, 31  ;;  %p169_p13 = scmp.lt.s32.totalorder (!%p142_p10), %s565_s29, 31 }
  0x14   : > { %s165_s18 = sand.u32 (!%p142_p10), 1, %s840_s10   ;;  %s599_s24 = sshll.u32 (!%p142_p10), %s852_s13, 5 }
  0x15   : > { %s564_s21 = sshll.u32 (!%p142_p10), %s165_s18, 7  ;;  %s469_s13 = sadd.s32 (!%p142_p10), %s848_s12, %s599_s24 }
  0x16   : > { %s1020_s25 = scalar_lea.vmem (!%p142_p10), [#allocation2], %s564_s21  ;;  %s596_s26 = sshll.u32 (!%p142_p10), %s469_s13, 7 }
  0x17   : > { %s1035_s12 = scalar_lea.hbm (!%p142_p10), %s1103_s2, %s596_s26  ;;  %s1049_s3 = scalar_lea.sflag (!%p142_p10), [#allocation3], %s165_s18 }
  0x18   : > { %s1120_s28 = smov (!%p175_p12, %s567_s28), 31  ;;  %s1122_s29 = smov (!%p169_p13, %s565_s29), 31 }
  0x19   : > { %s568_s30 = sshll.u32 %s1120_s28, 2  ;;  %s566_s6 = sshll.u32 %s1122_s29, 2 }
  0x1a   : > { %s961_s5 = scalar_lea.vmem %s1102_s1, %s568_s30  ;;  %s973_s17 = scalar_lea.vmem %s1101_s0, %s566_s6 }
  0x1b   : > { %v754_v0 = vld [vmem:[%s961_s5] sm:$0xff]   ;;  %v755_v1 = vld [vmem:[%s961_s5 + $0x8] sm:$0xff]   ;;  %v756_v3 = vld [vmem:[%s961_s5 + $0x10] sm:$0xff]   ;;  %s472_s28 = sshll.u32 %s1020_s25, 4  ;;  %s1039_s28 = int_to_ptr.vmem [resolvable:$true] %s472_s28 }
  0x1c   : > { %664 = vmatprep.subr.msk.bf16.mxu0 %vm294_vm0, %v754_v0  ;;  %665 = vmatprep.subr.msk.bf16.mxu1 %vm294_vm0, %v754_v0  ;;  %v320_v2 = vsel %vm294_vm0, %v754_v0, 0  ;;  %v323_v4 = vsel %vm294_vm0, %v755_v1, 0  ;;  %v762_v5 = vld [vmem:[%s973_s17] sm:$0xff]   ;;  %v326_v7 = vsel %vm294_vm0, %v756_v3, 0  ;;  %v757_v8 = vld [vmem:[%s961_s5 + $0x18] sm:$0xff]   ;;  %v759_v12 = vld [vmem:[%s961_s5 + $0x28] sm:$0xff]  }
  0x1d   : > { %617 = vmatpush3.bf16.xpose.msra.mxu0 %v320_v2  ;;  %656 = vmatpush3.bf16.xpose.msra.mxu1 %v320_v2  ;;  %v763_v6 = vld [vmem:[%s973_s17 + $0x20] sm:$0xff]   ;;  %v329_v9 = vsel %vm294_vm0, %v757_v8, 0  ;;  %v335_v13 = vsel %vm294_vm0, %v759_v12, 0  ;;  %v760_v14 = vld [vmem:[%s961_s5 + $0x30] sm:$0xff]   ;;  %v761_v16 = vld [vmem:[%s961_s5 + $0x38] sm:$0xff]   ;;  %s770_s4 = scalar_lea.vmem %s1039_s28, 2048 }
  0x1e   : > { %666 = vmatprep.subr.msk.bf16.mxu0 %vm294_vm0, %v755_v1  ;;  %667 = vmatprep.subr.msk.bf16.mxu1 %vm294_vm0, %v755_v1  ;;  %v758_v10 = vld [vmem:[%s961_s5 + $0x20] sm:$0xff]   ;;  %v338_v15 = vsel %vm294_vm0, %v760_v14, 0  ;;  %v341_v17 = vsel %vm294_vm0, %v761_v16, 0  ;;  %v764_v18 = vld [vmem:[%s973_s17 + $0x8] sm:$0xff]   ;;  %v766_v20 = vld [vmem:[%s973_s17 + $0x10] sm:$0xff]   ;;  %p771_p0 = scmp.ne.s32.totalorder %s1039_s28, %s770_s4  ;;  %s866_s5 = smov [#allocation2]  }
  0x1f   : > { %632 = vmatprep.mubr.msk.bf16.mxu0 %vm294_vm0, %v762_v5  ;;  %640 = vmatprep.mubr.msk.bf16.mxu1 %vm294_vm0, %v763_v6  ;;  %v332_v11 = vsel %vm294_vm0, %v758_v10, 0  ;;  %v765_v19 = vld [vmem:[%s973_s17 + $0x28] sm:$0xff]   ;;  %v767_v21 = vld [vmem:[%s973_s17 + $0x30] sm:$0xff]   ;;  %v768_v22 = vld [vmem:[%s973_s17 + $0x18] sm:$0xff]   ;;  %s774_s6 = sshll.u32 %s866_s5, 4  ;;  %s775_s6 = int_to_ptr.vmem [resolvable:$false] %s774_s6 }
  0x20   : > { %v769_v23 = vld [vmem:[%s973_s17 + $0x38] sm:$0xff]   ;;  %p772_p1 = pnand %p771_p0, %p936_p3  ;;  %s776_s7 = scalar_lea.vmem %s775_s6, 4096 }
  0x21   : > { %p777_p4 = scmp.lt.s32.totalorder %s1039_s28, %s775_s6  ;;  %p778_p5 = scmp.lt.s32.totalorder %s776_s7, %s770_s4 }
  0x22   : > { %p773_p2 = pneg %p772_p1 }
  0x23   : > { %p779_p6 = por %p778_p5, %p777_p4 }
  0x25   : > { %619 = vmatpush3.bf16.xpose.msra.mxu0 %v323_v4  ;;  %657 = vmatpush3.bf16.xpose.msra.mxu1 %v323_v4  ;;  %p780_p7 = pnand %p779_p6, %p773_p2 }
  0x26   : > { %668 = vmatprep.subr.msk.bf16.mxu0 %vm294_vm0, %v756_v3  ;;  %669 = vmatprep.subr.msk.bf16.mxu1 %vm294_vm0, %v756_v3 }
  0x2d   : > { %621 = vmatpush3.bf16.xpose.msra.mxu0 %v326_v7  ;;  %658 = vmatpush3.bf16.xpose.msra.mxu1 %v326_v7 }
  0x2e   : > { %670 = vmatprep.subr.msk.bf16.mxu0 %vm294_vm0, %v757_v8  ;;  %671 = vmatprep.subr.msk.bf16.mxu1 %vm294_vm0, %v757_v8 }
  0x35   : > { %623 = vmatpush3.bf16.xpose.msra.mxu0 %v329_v9  ;;  %659 = vmatpush3.bf16.xpose.msra.mxu1 %v329_v9 }
  0x36   : > { %672 = vmatprep.subr.msk.bf16.mxu0 %vm294_vm0, %v758_v10  ;;  %673 = vmatprep.subr.msk.bf16.mxu1 %vm294_vm0, %v758_v10 }
  0x3d   : > { %625 = vmatpush3.bf16.xpose.msra.mxu0 %v332_v11  ;;  %660 = vmatpush3.bf16.xpose.msra.mxu1 %v332_v11 }
  0x3e   : > { %674 = vmatprep.subr.msk.bf16.mxu0 %vm294_vm0, %v759_v12  ;;  %675 = vmatprep.subr.msk.bf16.mxu1 %vm294_vm0, %v759_v12 }
  0x45   : > { %627 = vmatpush3.bf16.xpose.msra.mxu0 %v335_v13  ;;  %661 = vmatpush3.bf16.xpose.msra.mxu1 %v335_v13 }
  0x46   : > { %676 = vmatprep.subr.msk.bf16.mxu0 %vm294_vm0, %v760_v14  ;;  %677 = vmatprep.subr.msk.bf16.mxu1 %vm294_vm0, %v760_v14 }
  0x4d   : > { %629 = vmatpush3.bf16.xpose.msra.mxu0 %v338_v15  ;;  %662 = vmatpush3.bf16.xpose.msra.mxu1 %v338_v15 }
  0x4e   : > { %678 = vmatprep.subr.msk.bf16.mxu0 %vm294_vm0, %v761_v16  ;;  %679 = vmatprep.subr.msk.bf16.mxu1 %vm294_vm0, %v761_v16 }
  0x55   : > { %631 = vmatpush3.bf16.xpose.msra.mxu0 %v341_v17  ;;  %663 = vmatpush3.bf16.xpose.msra.mxu1 %v341_v17 }
  0x5c   : > { %633 = vmatmul.mubr.msk.bf16.vlgmr.msra.gmra.mrb[0].mxu0 %vm294_vm0, %v764_v18  ;;  %641 = vmatmul.mubr.msk.bf16.vlgmr.msra.gmra.mrb[0].mxu1 %vm294_vm0, %v765_v19 }
  0x5d   : > { %636 = vmatprep.mubr.msk.bf16.mxu0 %vm294_vm0, %v766_v20  ;;  %644 = vmatprep.mubr.msk.bf16.mxu1 %vm294_vm0, %v767_v21 }
  0x64   : > { %637 = vmatmul.mubr.msk.bf16.gmra.mrb[4].mxu0 %vm294_vm0, %v768_v22  ;;  %645 = vmatmul.mubr.msk.bf16.gmra.mrb[4].mxu1 %vm294_vm0, %v769_v23 }
 0x12f   : > { %v634_v24 = vpop.f32.mrb[0].mxu0  ;;  %v642_v25 = vpop.f32.mrb[0].mxu1 }
 0x130   : > { %442 = vst [vmem:[%s1020_s25 + $0x10] sm:$0xff] %v634_v24  ;;  %450 = vst [vmem:[%s1020_s25 + $0x50] sm:$0xff] %v642_v25  ;;  %v377_v26 = vpop.f32.mrb[1].mxu0  ;;  %v409_v27 = vpop.f32.mrb[1].mxu1 }
 0x131   : > { %440 = vst [vmem:[%s1020_s25] sm:$0xff] %v377_v26  ;;  %448 = vst [vmem:[%s1020_s25 + $0x40] sm:$0xff] %v409_v27  ;;  %v635_v28 = vpop.f32.mrb[2].mxu0  ;;  %v643_v29 = vpop.f32.mrb[2].mxu1 }
 0x132   : > { %443 = vst [vmem:[%s1020_s25 + $0x18] sm:$0xff] %v635_v28  ;;  %451 = vst [vmem:[%s1020_s25 + $0x58] sm:$0xff] %v643_v29  ;;  %v380_v30 = vpop.f32.mrb[3].mxu0  ;;  %v412_v31 = vpop.f32.mrb[3].mxu1 }
 0x133   : > { %441 = vst [vmem:[%s1020_s25 + $0x8] sm:$0xff] %v380_v30  ;;  %449 = vst [vmem:[%s1020_s25 + $0x48] sm:$0xff] %v412_v31 }
 0x137   : > { %v638_v32 = vpop.f32.mrb[4].mxu0  ;;  %v646_v33 = vpop.f32.mrb[4].mxu1 }
 0x138   : > { %446 = vst [vmem:[%s1020_s25 + $0x30] sm:$0xff] %v638_v32  ;;  %454 = vst [vmem:[%s1020_s25 + $0x70] sm:$0xff] %v646_v33  ;;  %v393_v34 = vpop.f32.mrb[5].mxu0  ;;  %v425_v35 = vpop.f32.mrb[5].mxu1 }
 0x139   : > { %444 = vst [vmem:[%s1020_s25 + $0x20] sm:$0xff] %v393_v34  ;;  %452 = vst [vmem:[%s1020_s25 + $0x60] sm:$0xff] %v425_v35  ;;  %v639_v36 = vpop.f32.mrb[6].mxu0  ;;  %v647_v37 = vpop.f32.mrb[6].mxu1 }
 0x13a   : > { %447 = vst [vmem:[%s1020_s25 + $0x38] sm:$0xff] %v639_v36  ;;  %455 = vst [vmem:[%s1020_s25 + $0x78] sm:$0xff] %v647_v37  ;;  %v396_v38 = vpop.f32.mrb[7].mxu0  ;;  %v428_v39 = vpop.f32.mrb[7].mxu1 }
 0x13b   : > { %445 = vst [vmem:[%s1020_s25 + $0x28] sm:$0xff] %v396_v38  ;;  %453 = vst [vmem:[%s1020_s25 + $0x68] sm:$0xff] %v428_v39 }
 0x13c   : > { %783 = shalt.err (!%p780_p7)
}
 0x13d   : > { %s784_s8 = scalar_lea.hbm %s1035_s12, 2048  ;;  %s788_s21 = scalar_lea.hbm %s1103_s2, 8192 }
 0x13e   : > { %p785_p9 = scmp.ne.s32.totalorder %s1035_s12, %s784_s8  ;;  %p789_p12 = scmp.lt.u32.totalorder %s1035_s12, %s1103_s2 }
 0x13f   : > { %p790_p13 = scmp.lt.u32.totalorder %s788_s21, %s784_s8  ;;  %p792_p1 = scmp.lt.u32.totalorder %s784_s8, %s1035_s12 }
 0x140   : > { %p786_p10 = pnand %p785_p9, %p936_p3 }
 0x141   : > { %p791_p0 = por %p790_p13, %p789_p12 }
 0x142   : > { %p787_p11 = pneg %p786_p10 }
 0x143   : > { %p793_p2 = por %p792_p1, %p791_p0 }
 0x145   : > { %p794_p4 = pnand %p793_p2, %p787_p11 }
 0x147   : > { %797 = shalt.err (!%p794_p4)
}
 0x148   : > { %s867_s13 = smov 128   ;;  %s868_s26 = smov 256  }
 0x149   : > { %s869_s29 = smov 8  }
 0x14a   : > { %680 = dma.vmem_to_hbm [thread:$0]  (%p936_p3), %s1039_s28, 2048, %s1035_s12, %s1049_s3, %s867_s13, %s868_s26, %s869_s29  }
 0x14b PF: > { %p686_p5 = scmp.ge.s32.totalorder %s864_s16, 2  ;;  %s487_s30 = sand.u32 1, %s836_s9  }
 0x14c   : > { %s488_s4 = scalar_lea.sflag [#allocation3], %s487_s30 }
 0x14d   : > { %p683_p6 = pnand %p686_p5, %p945_p8 }
 0x14f   : > { %831 = dma.done.wait (!%p683_p6), %s488_s4, 2048  }
 0x150   : > { %833 = vsyncadd (!%p683_p6), %s488_s4, 4294965248  ;;  %s15_s16 = sadd.s32 1, %s864_s16   ;;  %s1106_s9 = smov %s840_s10 }
 0x151   : > { %p12_p7 = scmp.ge.s32.totalorder %s15_s16, 6   ;;  %s1107_s10 = smov %s844_s11 }
 0x152   : > { %s1108_s11 = smov %s954_s27  ;;  %s1109_s12 = smov %s856_s14 }
 0x153   : > { %s1110_s13 = smov %s860_s15  ;;  %s1111_s14 = smov %s1114_s19 }
 0x154   : > { %s1112_s15 = smov %s1118_s20  ;;  %14 = sbr.rel (!%p12_p7) target bundleno = 5 (0x5), region = 66 }
 0x15b   :  { %493 = vsyncpa [#allocation3], 1 }
 0x15c   :  { %495 = vsyncpa [#allocation3 + $0x1], 1 }

</bundles_post_ra>
